<compile_context>
chip_gen: v7x
topology: tpu7x:2x2x1
jax: 0.10.0
libtpu: 0.0.40
codegen_flags: <defaults>
</compile_context>

<pallas_src>
from functools import partial

import jax
import jax.numpy as jnp
from jax.experimental import pallas as pl
from jax.experimental.pallas import tpu as pltpu


def _round_up(a, m):
    return ((a + m - 1) // m) * m


def _spec_proj_kernel(x_ref, w_ref, b_ref, o_ref):
    # x_ref : (TM, K)    one block of tokens, K = P*P*D (pixel-major, depth last)
    # w_ref : (K, Eo)    fused (spectral-adapter ∘ patch-projection) weight (resident)
    # b_ref : (1, Eo)    fused bias, f32 (resident)
    # o_ref : (TM, Eo)
    acc = jnp.dot(x_ref[...], w_ref[...], preferred_element_type=jnp.float32)
    o_ref[...] = (acc + b_ref[...]).astype(o_ref.dtype)


def _vmem_capacity_bytes():
    try:
        return int(pltpu.get_tpu_info().vmem_capacity_bytes)
    except Exception:
        return 64 * 1024 * 1024  # conservative fallback (v7x per-TC VMEM)


@partial(jax.jit, static_argnums=(5,),
         static_argnames=("tm", "compute_dtype", "out_dtype",
                          "input_format", "output_format"))
def spectral_adapter_projection(x, w1, b1, w2, b2, token_patch_size, *,
                                tm=1024, compute_dtype=jnp.bfloat16,
                                out_dtype=None,
                                input_format="nchw", output_format="nchw"):
    """Fused spectral-adapter + patch-projection.

    x  : [B, D, H, W] (input_format="nchw", module default) or [B, H, W, D] ("nhwc").
    w1 : [D, Cr]  1x1-conv weight of the spectral adapter;   b1: [Cr]
    w2 : [E, Cr, P, P]  PyTorch Conv2d weight (kernel==stride==P);  b2: [E]
    Returns [B, E, H/P, W/P] (output_format="nchw", module semantics) or
    [B, (H/P)*(W/P), E] token-major (output_format="tokens", skips one HBM pass).
    compute_dtype: bf16 by default (2x on the HBM roofline); accumulation stays f32.
    """
    P = int(token_patch_size)
    if input_format == "nchw":
        B, D, H, W = x.shape
    elif input_format == "nhwc":
        B, H, W, D = x.shape
    else:
        raise ValueError(f"unknown input_format {input_format!r}")
    if output_format not in ("nchw", "tokens"):
        raise ValueError(f"unknown output_format {output_format!r}")
    assert H % P == 0 and W % P == 0, "spatial dims must be divisible by patch size"
    assert w1.shape[0] == D, "w1 depth must match input spectral depth"

    E = w2.shape[0]
    Nh, Nw = H // P, W // P
    n_tok = B * Nh * Nw
    K = P * P * D

    cdtype = jnp.dtype(x.dtype if compute_dtype is None else compute_dtype)
    odtype = jnp.dtype(x.dtype if out_dtype is None else out_dtype)

    # ---- host-side weight/bias fusion (runs once under jit; f32) ----
    w1f = w1.astype(jnp.float32)
    w2f = w2.astype(jnp.float32)
    w_fused = jnp.einsum("dc,ecpq->pqde", w1f, w2f).reshape(K, E)          # [(p,q,d), E]
    b_fused = (b2.astype(jnp.float32)
               + jnp.einsum("c,ecpq->e", b1.astype(jnp.float32), w2f)).reshape(1, E)

    # ---- pad E to a lane-dense multiple of 128 (unmasked vst) when cheap ----
    E_pad = _round_up(E, 128)
    pad_e = (E_pad != E) and (E_pad <= 2 * E)   # skip when padding would dominate stores
    E_out = E_pad if pad_e else E
    if pad_e:
        w_fused = jnp.pad(w_fused, ((0, 0), (0, E_pad - E)))
        b_fused = jnp.pad(b_fused, ((0, 0), (0, E_pad - E)))
    w_fused = w_fused.astype(cdtype)

    # ---- input rearrange -> patch-major [n_tok, P*P*D]: ONE transpose + fused cast ----
    if input_format == "nchw":
        x6 = x.reshape(B, D, Nh, P, Nw, P)
        x6 = jnp.transpose(x6, (0, 2, 4, 3, 5, 1))       # (b, i, j, p, q, d)
    else:  # nhwc: cheaper — only the patch-block transpose
        x6 = x.reshape(B, Nh, P, Nw, P, D)
        x6 = jnp.transpose(x6, (0, 1, 3, 2, 4, 5))       # (b, i, j, p, q, d)
    x_pat = x6.reshape(n_tok, K).astype(cdtype)
    # TODO(synk): read straight from NHWC inside the kernel (grid over patch rows,
    # in-kernel contraction over (p,q,d)) to drop this remaining HBM pass entirely
    # once Mosaic reshapes of (P,P,D)->lane are robust for arbitrary P/D.

    # ---- tile size: large, MXU-aligned, generation-aware VMEM budget ----
    in_isz = jnp.dtype(cdtype).itemsize
    out_isz = jnp.dtype(odtype).itemsize
    K_lane = _round_up(K, 128)
    E_lane = _round_up(E_out, 128)
    w_bytes = _round_up(K, 8) * E_lane * in_isz          # single-buffered (Buffered(1))
    b_bytes = 8 * E_lane * 4

    vmem_cap = _vmem_capacity_bytes()
    budget = min(int(vmem_cap * 0.55), 64 * 1024 * 1024)  # ~35 MiB on v7x, 64 MiB v5e/v6e

    def vmem_usage(t):
        return (2 * t * K_lane * in_isz       # double-buffered input tile
                + 2 * t * E_lane * out_isz    # double-buffered output tile
                + w_bytes + b_bytes)          # resident weight + bias

    if n_tok >= 512:
        align = 256          # full 256x256 MXU M-passes (v6e/v7x); also fine on v5e
    elif n_tok >= 128:
        align = 128
    else:
        align = 8
    tm_eff = max(align, min(tm, _round_up(n_tok, align)))
    tm_eff = _round_up(tm_eff, align)
    if n_tok >= 2 * align:   # guarantee >= 2 grid steps so both v7x TCs get work
        tm_eff = min(tm_eff, _round_up((n_tok + 1) // 2, align))
    while tm_eff > align and vmem_usage(tm_eff) > budget:
        tm_eff = max(align, _round_up(tm_eff // 2, align))

    n_pad = _round_up(n_tok, tm_eff)
    if n_pad != n_tok:
        x_pat = jnp.pad(x_pat, ((0, n_pad - n_tok), (0, 0)))
    grid = (n_pad // tm_eff,)

    usage = vmem_usage(tm_eff)
    vmem_limit = int(min(vmem_cap * 0.9,
                         max(usage + usage // 2 + (2 << 20), 32 << 20)))

    cost = pl.CostEstimate(
        flops=2 * n_pad * K * E_out,
        transcendentals=0,
        bytes_accessed=(n_pad * K * in_isz          # activations in
                        + K * E_out * in_isz        # fused weight
                        + E_out * 4                 # fused bias
                        + n_pad * E_out * out_isz)) # tokens out

    out = pl.pallas_call(
        _spec_proj_kernel,
        out_shape=jax.ShapeDtypeStruct((n_pad, E_out), odtype),
        grid=grid,
        in_specs=[
            pl.BlockSpec((tm_eff, K), lambda i: (i, 0)),          # token tile (lane-dense)
            pl.BlockSpec((K, E_out), lambda i: (0, 0),            # fused weight (resident,
                         pipeline_mode=pl.Buffered(1)),           #   single-buffered)
            pl.BlockSpec((1, E_out), lambda i: (0, 0),            # fused bias (resident)
                         pipeline_mode=pl.Buffered(1)),
        ],
        out_specs=pl.BlockSpec((tm_eff, E_out), lambda i: (i, 0)),
        compiler_params=pltpu.CompilerParams(
            dimension_semantics=("parallel",),
            vmem_limit_bytes=vmem_limit,
        ),
        cost_estimate=cost,
    )(x_pat, w_fused, b_fused)

    out = out[:n_tok, :E].reshape(B, Nh, Nw, E)
    if output_format == "tokens":
        return out.reshape(B, Nh * Nw, E)          # no extra HBM transpose
    return jnp.transpose(out, (0, 3, 1, 2))        # NCHW, matches the PyTorch module


def _reference(x, w1, b1, w2, b2, P):
    """Plain-JAX reference matching the PyTorch forward semantics (NCHW in/out)."""
    a = jnp.einsum("bdhw,dc->bchw", x, w1) + b1[None, :, None, None]
    B, Cr, H, W = a.shape
    Nh, Nw = H // P, W // P
    a_p = a.reshape(B, Cr, Nh, P, Nw, P)
    o = jnp.einsum("bcipjq,ecpq->beij", a_p, w2) + b2[None, :, None, None]
    return o


if __name__ == "__main__":
    # Small shapes consistent with the module's forward:
    B, D, H, W = 2, 4, 16, 16          # [batch, spectral depth, height, width]
    reduced_channels = 8               # Cr (spectral adapter output channels)
    embed_dim = 32                     # E
    token_patch_size = 4               # P

    key = jax.random.PRNGKey(0)
    kx, k1, kb1, k2, kb2 = jax.random.split(key, 5)

    x = jax.random.normal(kx, (B, D, H, W), dtype=jnp.float32)

    # Deterministic parameter init (synthetic; shapes from the module __init__):
    w1 = jax.random.normal(k1, (D, reduced_channels), dtype=jnp.float32) * 0.1
    b1 = jax.random.normal(kb1, (reduced_channels,), dtype=jnp.float32) * 0.1
    w2 = jax.random.normal(
        k2, (embed_dim, reduced_channels, token_patch_size, token_patch_size),
        dtype=jnp.float32) * 0.05
    b2 = jax.random.normal(kb2, (embed_dim,), dtype=jnp.float32) * 0.1

    ref = _reference(x, w1, b1, w2, b2, token_patch_size)

    # f32 compute path (exact module semantics)
    out_f32 = spectral_adapter_projection(x, w1, b1, w2, b2, token_patch_size,
                                          compute_dtype=jnp.float32)
    out_f32 = jax.block_until_ready(out_f32)
    assert out_f32.shape == (B, embed_dim, H // token_patch_size, W // token_patch_size)
    assert jnp.allclose(out_f32, ref, atol=1e-4, rtol=1e-3), "f32 mismatch vs reference"

    # Default path: bf16 compute (f32 accumulation), NCHW output
    out_bf16 = spectral_adapter_projection(x, w1, b1, w2, b2, token_patch_size)
    out_bf16 = jax.block_until_ready(out_bf16)
    assert out_bf16.shape == out_f32.shape
    assert float(jnp.max(jnp.abs(out_bf16 - ref))) < 5e-2, "bf16 mismatch vs reference"

    # Token-major output option (skips the final NCHW transpose for ViT consumers)
    out_tok = spectral_adapter_projection(x, w1, b1, w2, b2, token_patch_size,
                                          output_format="tokens")
    out_tok = jax.block_until_ready(out_tok)
    ref_tok = jnp.transpose(ref, (0, 2, 3, 1)).reshape(B, -1, embed_dim)
    assert out_tok.shape == ref_tok.shape
    assert float(jnp.max(jnp.abs(out_tok - ref_tok))) < 5e-2, "token output mismatch"

    print("KERNEL_OK")
</pallas_src>

<mosaic_0001>
module attributes {stable_mosaic.version = 11 : i64} {
  func.func @_spec_proj_kernel(%arg0: i32, %arg1: memref<16x64xf32, #tpu.memory_space<vmem>>, %arg2: memref<64x32xf32, #tpu.memory_space<vmem>>, %arg3: memref<1x32xf32, #tpu.memory_space<vmem>>, %arg4: memref<16x32xf32, #tpu.memory_space<vmem>>) attributes {dimension_semantics = [#tpu.dimension_semantics<parallel>], iteration_bounds = array<i64: 2>, scalar_prefetch = 0 : i64, scratch_operands = 0 : i64, tpu.core_type = #tpu.core_type<tc>, window_params = [{transform_indices = @transform_0, window_bounds = array<i64: 16, 64>}, {pipeline_mode = #tpu.pipeline_mode<synchronous>, transform_indices = @transform_1, window_bounds = array<i64: 64, 32>}, {pipeline_mode = #tpu.pipeline_mode<synchronous>, transform_indices = @transform_2, window_bounds = array<i64: 1, 32>}, {transform_indices = @transform_3, window_bounds = array<i64: 16, 32>}]} {
    %c0 = arith.constant 0 : index
    %c0_0 = arith.constant 0 : index
    %0 = vector.load %arg1[%c0, %c0_0] : memref<16x64xf32, #tpu.memory_space<vmem>>, vector<16x64xf32>
    %c0_1 = arith.constant 0 : index
    %c0_2 = arith.constant 0 : index
    %1 = vector.load %arg2[%c0_1, %c0_2] : memref<64x32xf32, #tpu.memory_space<vmem>>, vector<64x32xf32>
    %cst = arith.constant dense<0.000000e+00> : vector<16x32xf32>
    %2 = tpu.matmul %0, %1, %cst {dimension_numbers = #tpu.dot_dimension_numbers<[1], [0], [0], [1], [0, 0, 1, 1], [], []>} : vector<16x64xf32>, vector<64x32xf32>, vector<16x32xf32> -> vector<16x32xf32>
    %c0_3 = arith.constant 0 : index
    %c0_4 = arith.constant 0 : index
    %3 = vector.load %arg3[%c0_3, %c0_4] : memref<1x32xf32, #tpu.memory_space<vmem>>, vector<1x32xf32>
    %4 = vector.broadcast %3 : vector<1x32xf32> to vector<16x32xf32>
    %5 = arith.addf %2, %4 : vector<16x32xf32>
    %c0_5 = arith.constant 0 : index
    %c0_6 = arith.constant 0 : index
    %6 = vector.load %arg4[%c0_5, %c0_6] : memref<16x32xf32, #tpu.memory_space<vmem>>, vector<16x32xf32>
    tpu.vector_store %arg4[%c0_5, %c0_6], %5 {strides = array<i32>} : memref<16x32xf32, #tpu.memory_space<vmem>>, vector<16x32xf32>,
    return
  }
  func.func @transform_0(%arg0: i32) -> (i32, i32) {
    %c0_i32 = arith.constant 0 : i32
    %c0_i32_0 = arith.constant 0 : i32
    return %arg0, %c0_i32 : i32, i32
  }
  func.func @transform_1(%arg0: i32) -> (i32, i32) {
    %c0_i32 = arith.constant 0 : i32
    %c0_i32_0 = arith.constant 0 : i32
    %c0_i32_1 = arith.constant 0 : i32
    return %c0_i32, %c0_i32_0 : i32, i32
  }
  func.func @transform_2(%arg0: i32) -> (i32, i32) {
    %c0_i32 = arith.constant 0 : i32
    %c0_i32_0 = arith.constant 0 : i32
    %c0_i32_1 = arith.constant 0 : i32
    return %c0_i32, %c0_i32_0 : i32, i32
  }
  func.func @transform_3(%arg0: i32) -> (i32, i32) {
    %c0_i32 = arith.constant 0 : i32
    %c0_i32_0 = arith.constant 0 : i32
    return %arg0, %c0_i32 : i32, i32
  }
}

</mosaic_0001>

<bundles_post_ra>
// kernel: spectral_adapter_projection.1
= control target key start
LH: loop header
LB: loop body
LE: loop exit
PB: predicated region body
PF: predicated region fallthrough
CT: control target
= control target key end

     0   :  { %8 = vsyncpa [#allocation3], 0  ;;  %s668_s0 = inlined_call_operand.vmem [shape: f32[32,64], index: 0, kind: input, shape index: {}]   ;;  %s669_s1 = inlined_call_operand.vmem [shape: f32[64,32], index: 1, kind: input, shape index: {}]   ;;  %s670_s2 = inlined_call_operand.vmem [shape: f32[1,32], index: 2, kind: input, shape index: {}]   ;;  %s671_s3 = inlined_call_operand.hbm [shape: f32[32,32], index: 3, kind: output, shape index: {}]  }
   0x1   :  { %10 = vsyncpa [#allocation3 + $0x1], 0  ;;  %s539_s12 = smov 0   ;;  %s541_s13 = smov 0  }
   0x2   :  { %s543_s14 = smov 0   ;;  %s545_s15 = smov 0  }
   0x3 LB: > { %s560_s16 = sadd.s32 4294967295, %s514_s15   ;;  %s350_s17 = sadd.s32 4294967294, %s514_s15   ;;  %s514_s15 = sphi %s545_s15, %s677_s15   ;;  %s510_s14 = sphi %s543_s14, %s676_s14   ;;  %s506_s13 = sphi %s541_s13, %s675_s13   ;;  %s502_s12 = sphi %s539_s12, %s674_s12  }
   0x4   : > { %s564_s18 = sadd.s32 1, %s514_s15   ;;  %s91_s19 = sadd.s32 1, %s510_s14 }
   0x5   : > { %s88_s20 = ssub.s32 %s514_s15, %s564_s18  ;;  %p101_p0 = scmp.ne.s32.totalorder %s510_s14, %s506_s13 }
   0x6   : > { %p89_p1 = scmp.eq.s32.totalorder %s88_s20, 0  ;;  %p102_p2 = scmp.eq.s32.totalorder %s560_s16, 1 }
   0x7   : > { %p107_p3 = scmp.ne.s32.totalorder %s506_s13, %s502_s12  ;;  %p108_p4 = scmp.eq.s32.totalorder %s350_s17, 1 }
   0x8   : > { %s575_s21 = scalar_select %p89_p1, %s510_s14, %s91_s19  }
   0x9   : > { %p577_p5 = por %p102_p2, %p101_p0  ;;  %p581_p6 = por %p108_p4, %p107_p3 }
   0xa   : > { %p353_p7 = scmp.ge.s32.totalorder %s514_s15, 1  ;;  %p141_p8 = scmp.lt.s32.totalorder %s514_s15, 3 }
   0xc   : > { %p142_p9 = pnand %p353_p7, %p141_p8 }
   0xd   : > { %v174_v0 = vld [vmem:[%s669_s1] sm:$0xff] (!%p142_p9)  ;;  %v175_v1 = vld [vmem:[%s669_s1 + $0x8] sm:$0xff] (!%p142_p9)  ;;  %v176_v2 = vld [vmem:[%s669_s1 + $0x10] sm:$0xff] (!%p142_p9)  ;;  %s355_s30 = sshll.u32 (!%p142_p9), %s560_s16, 1  ;;  %vm189_vm0 = vcmask (!%p142_p9), 523264   ;;  %s162_s27 = sand.u32 (!%p142_p9), 1, %s506_s13  }
   0xe   : > { %145 = sbr.rel (%p142_p9) target bundleno = 262 (0x106), region = 32  ;;  %v395_v3 = vpack.c.bf16 (!%p142_p9), %v175_v1, %v174_v0  ;;  %v177_v4 = vld [vmem:[%s669_s1 + $0x18] sm:$0xff] (!%p142_p9)  ;;  %p166_p10 = scmp.lt.s32.totalorder (!%p142_p9), %s355_s30, 3  ;;  %v178_v6 = vld [vmem:[%s669_s1 + $0x20] sm:$0xff] (!%p142_p9)  ;;  %v179_v7 = vld [vmem:[%s669_s1 + $0x28] sm:$0xff] (!%p142_p9)  ;;  %vm271_vm1 = vcmask (!%p142_p9), 261120  }
   0xf   : > { %v399_v5 = vpack.c.bf16 (!%p142_p9), %v177_v4, %v176_v2  ;;  %v403_v8 = vpack.c.bf16 (!%p142_p9), %v179_v7, %v178_v6  ;;  %v180_v9 = vld [vmem:[%s669_s1 + $0x30] sm:$0xff] (!%p142_p9)  ;;  %v181_v10 = vld [vmem:[%s669_s1 + $0x38] sm:$0xff] (!%p142_p9)  ;;  %s354_s28 = sshll.u32 (!%p142_p9), %s162_s27, 4  ;;  %v357_v14 = vld [vmem:[%s670_s2] ss:$0 sm:$0xff] (!%p142_p9)  ;;  %s365_s6 = sshll.u32 (!%p142_p9), %s560_s16, 8 }
  0x10   : > { %396 = vmatprep.subr.bf16.mxu0 (!%p142_p9), %v395_v3  ;;  %v407_v12 = vpack.c.bf16 (!%p142_p9), %v181_v10, %v180_v9  ;;  %s164_s4 = scalar_lea.vmem (!%p142_p9), [#allocation2], %s354_s28  ;;  %s625_s9 = scalar_lea.hbm (!%p142_p9), %s671_s3, %s365_s6 }
  0x11   : > { %398 = vmatpush3.bf16.msra.mxu0 (!%p142_p9), %v395_v3  ;;  %s288_s5 = sshll.u32 (!%p142_p9), %s164_s4, 4  ;;  %s516_s11 = smov (!%p142_p9), [#allocation2]   ;;  %s620_s5 = int_to_ptr.vmem [resolvable:$true] %s288_s5 }
  0x12   : > { %400 = vmatprep.subr.bf16.mxu0 (!%p142_p9), %v399_v5  ;;  %s452_s16 = scalar_lea.vmem (!%p142_p9), %s620_s5, 256  ;;  %s456_s17 = sshll.u32 (!%p142_p9), %s516_s11, 4  ;;  %s457_s17 = int_to_ptr.vmem [resolvable:$false] %s456_s17 }
  0x13   : > { %p453_p11 = scmp.ne.s32.totalorder (!%p142_p9), %s620_s5, %s452_s16  ;;  %s458_s19 = scalar_lea.vmem (!%p142_p9), %s457_s17, 512 }
  0x14   : > { %p459_p0 = scmp.lt.s32.totalorder (!%p142_p9), %s620_s5, %s457_s17  ;;  %p460_p1 = scmp.lt.s32.totalorder (!%p142_p9), %s458_s19, %s452_s16 }
  0x15   : > { %s679_s30 = smov (!%p166_p10, %s355_s30), 3  ;;  %402 = vmatpush3.bf16.msra.mxu0 %v399_v5  ;;  %p454_p12 = pnand %p453_p11, %p577_p5 }
  0x16   : > { %s356_s10 = sshll.u32 %s679_s30, 3  ;;  %404 = vmatprep.subr.bf16.mxu0 %v403_v8  ;;  %p461_p2 = por %p460_p1, %p459_p0 }
  0x17   : > { %s169_s26 = scalar_lea.vmem %s668_s0, %s356_s10  ;;  %s627_s10 = scalar_lea.sflag [#allocation3], %s162_s27 }
  0x18   : > { %v172_v11 = vld [vmem:[%s169_s26] sm:$0xff]  ;;  %v173_v13 = vld [vmem:[%s169_s26 + $0x8] sm:$0xff]  ;;  %p455_p13 = pneg %p454_p12 }
  0x19   : > { %392 = vmatprep.mubr.msk.f32.mxu0 %vm189_vm0, %v172_v11  ;;  %406 = vmatpush3.bf16.msra.mxu0 %v403_v8 }
  0x1a   : > { %408 = vmatprep.subr.bf16.mxu0 %v407_v12  ;;  %p462_p3 = pnand %p461_p2, %p455_p13 }
  0x1d   : > { %410 = vmatpush3.bf16.msra.mxu0 %v407_v12 }
  0x20   : > { %393 = vmatmul.mubr.msk.f32.vlgmr.msra.gmra.mrb[0].mxu0 %vm189_vm0, %v173_v13 }
  0xf3   : > { %v394_v15 = vpop.f32.mrb[0].mxu0 }
  0xf4   : > { %v268_v16 = vadd.f32 %v394_v15, %v357_v14  ;;  %v262_v17 = vpop.f32.mrb[1].mxu0 }
  0xf5   : > { %v263_v18 = vadd.f32 %v357_v14, %v262_v17 }
  0xf6   : > { %273 = vst.msk [vmem:[%s164_s4 + $0x8] sm:$0xff] %vm271_vm1, %v268_v16 }
  0xf7   : > { %272 = vst.msk [vmem:[%s164_s4] sm:$0xff] %vm271_vm1, %v263_v18 }
  0xf8   : > { %465 = shalt.err (!%p462_p3)
}
  0xf9   : > { %s466_s20 = scalar_lea.hbm %s625_s9, 256  ;;  %s470_s26 = scalar_lea.hbm %s671_s3, 512 }
  0xfa   : > { %p467_p4 = scmp.ne.s32.totalorder %s625_s9, %s466_s20  ;;  %p471_p9 = scmp.lt.u32.totalorder %s625_s9, %s671_s3 }
  0xfb   : > { %p472_p10 = scmp.lt.u32.totalorder %s470_s26, %s466_s20  ;;  %p474_p12 = scmp.lt.u32.totalorder %s466_s20, %s625_s9 }
  0xfc   : > { %p468_p7 = pnand %p467_p4, %p577_p5 }
  0xfd   : > { %p473_p11 = por %p472_p10, %p471_p9 }
  0xfe   : > { %p469_p8 = pneg %p468_p7 }
  0xff   : > { %p475_p13 = por %p474_p12, %p473_p11 }
 0x101   : > { %p476_p0 = pnand %p475_p13, %p469_p8 }
 0x103   : > { %479 = shalt.err (!%p476_p0)
}
 0x104   : > { %s517_s29 = smov 128   ;;  %s518_s30 = smov 8  }
 0x105   : > { %411 = dma.vmem_to_hbm [thread:$0]  (%p577_p5), %s620_s5, 256, %s625_s9, %s627_s10, %s517_s29, %s517_s29, %s518_s30  }
 0x106 PF: > { %p417_p1 = scmp.ge.s32.totalorder %s514_s15, 2  ;;  %s303_s4 = sand.u32 1, %s502_s12  }
 0x107   : > { %s304_s6 = scalar_lea.sflag [#allocation3], %s303_s4 }
 0x108   : > { %p414_p2 = pnand %p417_p1, %p581_p6 }
 0x10a   : > { %497 = dma.done.wait (!%p414_p2), %s304_s6, 256  }
 0x10b   : > { %499 = vsyncadd (!%p414_p2), %s304_s6, 4294967040  ;;  %p13_p3 = scmp.ge.s32.totalorder %s564_s18, 4   ;;  %s674_s12 = smov %s506_s13 }
 0x10c   : > { %s675_s13 = smov %s510_s14  ;;  %s676_s14 = smov %s575_s21 }
 0x10d   : > { %s677_s15 = smov %s564_s18  ;;  %15 = sbr.rel (!%p13_p3) target bundleno = 3 (0x3), region = 67 }
 0x114   :  { %309 = vsyncpa [#allocation3], 1 }
 0x115   :  { %311 = vsyncpa [#allocation3 + $0x1], 1 }

</bundles_post_ra>
